<compile_context>
chip_gen: v6e
topology: v6e:2x2x1
jax: 0.10.0
libtpu: 0.0.40
codegen_flags: <defaults>
</compile_context>

<pallas_src>
import jax
import jax.numpy as jnp
from jax.experimental import pallas as pl
from jax.experimental.pallas import tpu as pltpu


# ----------------------------- helpers ------------------------------------

def _round_up(x: int, m: int) -> int:
    return (x + m - 1) // m * m


def _cdiv(a: int, b: int) -> int:
    return (a + b - 1) // b


def _vmem_capacity_bytes() -> int:
    try:
        info = pltpu.get_tpu_info()
        cap = getattr(info, "vmem_capacity_bytes", None)
        if cap:
            return int(cap)
    except Exception:
        pass
    return 64 * 1024 * 1024  # conservative fallback (v7x per-core VMEM)


def _footprint(tm, th, n_pad, out_bytes, use_acc, w_buf=2):
    """Approximate VMEM bytes for one grid step (double-buffered pipeline)."""
    fp = (
        2 * tm * n_pad * 2            # x tile (bf16, double-buffered)
        + w_buf * n_pad * th * 2      # w1 slab (bf16)
        + w_buf * th * n_pad * 2      # w2 slab (bf16)
        + 2 * 8 * th * 4              # b1 slice (f32, sublane-padded)
        + 2 * 8 * n_pad * 4           # b2 (f32, sublane-padded)
        + 2 * tm * n_pad * out_bytes  # out tile
        + tm * th * 4                 # h intermediate (compiler temp)
    )
    if use_acc:
        fp += tm * n_pad * 4          # f32 accumulator scratch
    return fp


# ----------------------------- kernels ------------------------------------

def _mlp_kernel_single(x_ref, w1_ref, b1_ref, w2_ref, b2_ref, o_ref):
    # Whole hidden dim in one slice: no accumulator needed.
    h = jnp.dot(x_ref[...], w1_ref[0], preferred_element_type=jnp.float32)
    h = jnp.maximum(h + b1_ref[...], 0.0)
    out = jnp.dot(h.astype(w2_ref.dtype), w2_ref[...],
                  preferred_element_type=jnp.float32)
    o_ref[...] = (out + b2_ref[...]).astype(o_ref.dtype)


def _mlp_kernel_out_acc(x_ref, w1_ref, b1_ref, w2_ref, b2_ref, o_ref):
    # f32 output: accumulate directly into the resident output block (P3).
    kh = pl.program_id(1)
    h = jnp.dot(x_ref[...], w1_ref[0], preferred_element_type=jnp.float32)
    h = jnp.maximum(h + b1_ref[...], 0.0)
    contrib = jnp.dot(h.astype(w2_ref.dtype), w2_ref[...],
                      preferred_element_type=jnp.float32)

    @pl.when(kh == 0)
    def _init():
        o_ref[...] = contrib + b2_ref[...]

    @pl.when(kh > 0)
    def _accum():
        o_ref[...] += contrib


def _mlp_kernel_scratch_acc(x_ref, w1_ref, b1_ref, w2_ref, b2_ref, o_ref,
                            acc_ref):
    # Non-f32 output: accumulate in an f32 VMEM scratch, cast at the end.
    kh = pl.program_id(1)

    @pl.when(kh == 0)
    def _init():
        acc_ref[...] = jnp.zeros_like(acc_ref)

    h = jnp.dot(x_ref[...], w1_ref[0], preferred_element_type=jnp.float32)
    h = jnp.maximum(h + b1_ref[...], 0.0)
    acc_ref[...] += jnp.dot(h.astype(w2_ref.dtype), w2_ref[...],
                            preferred_element_type=jnp.float32)

    @pl.when(kh == pl.num_programs(1) - 1)
    def _finalize():
        o_ref[...] = (acc_ref[...] + b2_ref[...]).astype(o_ref.dtype)


# ----------------------------- planning -----------------------------------

def plan_mlp_tiles(n_embed, hidden, out_dtype=jnp.float32):
    """M-independent tiling plan (hidden slice size, padded dims, VMEM budget)."""
    out_bytes = jnp.dtype(out_dtype).itemsize
    n_pad = _round_up(n_embed, 128)
    h128 = _round_up(hidden, 128)

    vmem_cap = _vmem_capacity_bytes()
    budget = (vmem_cap * 3) // 4              # leave headroom for Mosaic scratch

    # Hidden slice: minimize padding of the last slice; prefer larger slices
    # on ties; must fit the VMEM budget even with a minimal row tile.
    cands = [c for c in (2048, 1536, 1024, 768, 512, 384, 256, 128) if c <= h128]
    if not cands:
        cands = [h128]
    feas = [c for c in cands
            if _footprint(16, c, n_pad, out_bytes, use_acc=True) <= budget]
    if not feas:
        feas = [min(cands)]
    waste = lambda c: _round_up(h128, c) - h128
    best = min(waste(c) for c in feas)
    th = max(c for c in feas if waste(c) == best)

    h_pad = _round_up(h128, th)
    n_h = h_pad // th
    return dict(n_embed=n_embed, hidden=hidden, n_pad=n_pad, th=th,
                h_pad=h_pad, n_h=n_h, out_dtype=out_dtype,
                vmem_cap=vmem_cap, budget=budget)


def _plan_tm(m, plan, use_acc):
    n_pad, th = plan["n_pad"], plan["th"]
    out_bytes = jnp.dtype(plan["out_dtype"]).itemsize
    budget = plan["budget"]

    m16 = _round_up(max(m, 1), 16)
    if m16 <= 256:
        tm = m16
    else:
        # Prefer large row tiles (amortize weight re-streaming), but split M
        # into roughly-equal aligned tiles to avoid gross padding.
        tm_pref = 1024
        while tm_pref > 256 and _footprint(tm_pref, th, n_pad, out_bytes,
                                           use_acc) > budget:
            tm_pref //= 2
        n_tiles = _cdiv(m16, tm_pref)
        per = _cdiv(m16, n_tiles)
        align = 128 if per >= 256 else 16
        tm = _round_up(per, align)

    # Final VMEM guard.
    while tm > 16 and _footprint(tm, th, n_pad, out_bytes, use_acc) > budget:
        tm = max(16, _round_up(tm // 2, 16))

    m_pad = _round_up(max(m, tm), tm)
    return tm, m_pad


# ----------------------------- params -------------------------------------

def prepare_mlp_params(w1, b1, w2, b2, plan):
    """One-time pad + bf16 cast of the weights (hoisted out of the forward).

    w1 is stored hidden-tile-major (n_h, n_pad, th) so each per-step weight
    DMA is a single contiguous slab.
    """
    n_embed, hidden = plan["n_embed"], plan["hidden"]
    n_pad, th, h_pad, n_h = plan["n_pad"], plan["th"], plan["h_pad"], plan["n_h"]

    w1_p = jnp.pad(w1, ((0, n_pad - n_embed), (0, h_pad - hidden))).astype(jnp.bfloat16)
    w1_p = w1_p.reshape(n_pad, n_h, th).transpose(1, 0, 2)          # (n_h, n_pad, th)
    b1_p = jnp.pad(b1.reshape(1, hidden).astype(jnp.float32),
                   ((0, 0), (0, h_pad - hidden)))
    w2_p = jnp.pad(w2, ((0, h_pad - hidden), (0, n_pad - n_embed))).astype(jnp.bfloat16)
    b2_p = jnp.pad(b2.reshape(1, n_embed).astype(jnp.float32),
                   ((0, 0), (0, n_pad - n_embed)))
    return w1_p, b1_p, w2_p, b2_p


# ----------------------------- forward ------------------------------------

def mlp_forward(x, prepared, plan):
    """x: (..., n_embed). prepared = prepare_mlp_params(...). Returns x-shaped."""
    w1_p, b1_p, w2_p, b2_p = prepared
    n_embed = plan["n_embed"]
    n_pad, th, h_pad, n_h = plan["n_pad"], plan["th"], plan["h_pad"], plan["n_h"]
    out_dtype = plan["out_dtype"]
    out_bytes = jnp.dtype(out_dtype).itemsize
    assert x.shape[-1] == n_embed

    lead_shape = x.shape[:-1]
    x2d = x.reshape(-1, n_embed)
    m = x2d.shape[0]

    is_f32_out = jnp.dtype(out_dtype) == jnp.float32
    if n_h == 1:
        kernel, scratch, use_acc = _mlp_kernel_single, [], False
    elif is_f32_out:
        kernel, scratch, use_acc = _mlp_kernel_out_acc, [], False
    else:
        kernel, use_acc = _mlp_kernel_scratch_acc, True
        scratch = None  # allocated after tm is known

    tm, m_pad = _plan_tm(m, plan, use_acc)
    n_m = m_pad // tm
    grid = (n_m, n_h)
    if scratch is None:
        scratch = [pltpu.VMEM((tm, n_pad), jnp.float32)]

    # Extra buffering on the two big weight streams if the hidden loop is
    # long and VMEM headroom allows (hides the dominant per-step DMA).
    w_buf = 2
    if n_h >= 3 and _footprint(tm, th, n_pad, out_bytes, use_acc,
                               w_buf=3) <= plan["budget"]:
        w_buf = 3
    w_kwargs = dict(pipeline_mode=pl.Buffered(3)) if w_buf == 3 else {}

    x_p = jnp.pad(x2d, ((0, m_pad - m), (0, n_pad - n_embed))).astype(jnp.bfloat16)

    fp = _footprint(tm, th, n_pad, out_bytes, use_acc, w_buf)
    vmem_limit = int(min(max(fp * 5 // 4, 32 * 1024 * 1024),
                         (plan["vmem_cap"] * 17) // 20))   # <= 85% of physical

    cost = pl.CostEstimate(
        flops=4 * m_pad * n_pad * h_pad,                    # two matmuls
        transcendentals=0,
        bytes_accessed=(m_pad * n_pad * 2                   # x in (bf16)
                        + m_pad * n_pad * out_bytes         # out
                        + n_m * 2 * n_pad * h_pad * 2       # w1+w2, re-streamed per M tile
                        + n_m * (h_pad + n_pad) * 4),       # biases per M tile
    )

    in_specs = [
        pl.BlockSpec((tm, n_pad), lambda i, k: (i, 0)),                  # x rows
        pl.BlockSpec((1, n_pad, th), lambda i, k: (k, 0, 0), **w_kwargs),  # w1 slab
        pl.BlockSpec((1, th), lambda i, k: (0, k)),                      # b1 slice
        pl.BlockSpec((th, n_pad), lambda i, k: (k, 0), **w_kwargs),      # w2 slab
        pl.BlockSpec((1, n_pad), lambda i, k: (0, 0)),                   # b2
    ]

    out2d = pl.pallas_call(
        kernel,
        out_shape=jax.ShapeDtypeStruct((m_pad, n_pad), out_dtype),
        grid_spec=pltpu.PrefetchScalarGridSpec(
            num_scalar_prefetch=0,
            grid=grid,
            in_specs=in_specs,
            out_specs=pl.BlockSpec((tm, n_pad), lambda i, k: (i, 0)),
            scratch_shapes=scratch,
        ),
        compiler_params=pltpu.CompilerParams(
            dimension_semantics=("parallel", "arbitrary"),
            vmem_limit_bytes=vmem_limit,
        ),
        cost_estimate=cost,
    )(x_p, w1_p, b1_p, w2_p, b2_p)

    return out2d[:m, :n_embed].reshape(*lead_shape, n_embed)


# ----------------------------- init / test --------------------------------

def init_mlp_params(key, n_embed, dtype=jnp.float32):
    """Mirrors nn.Linear's U(-1/sqrt(fan_in), 1/sqrt(fan_in)) init.
    Weights stored transposed vs PyTorch: (in_features, out_features)."""
    hidden = 4 * n_embed
    k1, k2, k3, k4 = jax.random.split(key, 4)
    bound1 = 1.0 / jnp.sqrt(n_embed)
    bound2 = 1.0 / jnp.sqrt(hidden)
    w1 = jax.random.uniform(k1, (n_embed, hidden), dtype, -bound1, bound1)
    b1 = jax.random.uniform(k2, (1, hidden), dtype, -bound1, bound1)
    w2 = jax.random.uniform(k3, (hidden, n_embed), dtype, -bound2, bound2)
    b2 = jax.random.uniform(k4, (1, n_embed), dtype, -bound2, bound2)
    return w1, b1, w2, b2


if __name__ == "__main__":
    key = jax.random.PRNGKey(0)
    kx, kp = jax.random.split(key)

    batch, seq, n_embed = 2, 8, 32          # hidden = 4 * n_embed = 128
    hidden = 4 * n_embed
    x = jax.random.normal(kx, (batch, seq, n_embed), jnp.float32)
    w1, b1, w2, b2 = init_mlp_params(kp, n_embed)

    plan = plan_mlp_tiles(n_embed, hidden, out_dtype=x.dtype)
    prepared = prepare_mlp_params(w1, b1, w2, b2, plan)   # one-time pad/cast

    out = mlp_forward(x, prepared, plan)
    out = jax.block_until_ready(out)
    assert out.shape == x.shape

    # Reference with matching precision (bf16 MXU operands, f32 accumulation).
    # Note: results differ from a pure-f32 PyTorch nn.Linear by bf16 precision.
    x2d = x.reshape(-1, n_embed)
    h_ref = jnp.maximum(
        jnp.dot(x2d.astype(jnp.bfloat16), w1.astype(jnp.bfloat16),
                preferred_element_type=jnp.float32) + b1, 0.0)
    ref2d = jnp.dot(h_ref.astype(jnp.bfloat16), w2.astype(jnp.bfloat16),
                    preferred_element_type=jnp.float32) + b2
    ref = ref2d.reshape(x.shape)

    assert jnp.allclose(out, ref, atol=1e-2, rtol=1e-2), (
        float(jnp.max(jnp.abs(out - ref))))

    print("KERNEL_OK")
</pallas_src>

<mosaic_0001>
module attributes {stable_mosaic.version = 11 : i64} {
  func.func @_mlp_kernel_single(%arg0: i32, %arg1: i32, %arg2: memref<16x128xbf16, #tpu.memory_space<vmem>>, %arg3: memref<1x128x128xbf16, #tpu.memory_space<vmem>>, %arg4: memref<1x128xf32, #tpu.memory_space<vmem>>, %arg5: memref<128x128xbf16, #tpu.memory_space<vmem>>, %arg6: memref<1x128xf32, #tpu.memory_space<vmem>>, %arg7: memref<16x128xf32, #tpu.memory_space<vmem>>) attributes {dimension_semantics = [#tpu.dimension_semantics<parallel>, #tpu.dimension_semantics<arbitrary>], iteration_bounds = array<i64: 1, 1>, scalar_prefetch = 0 : i64, scratch_operands = 0 : i64, tpu.core_type = #tpu.core_type<tc>, window_params = [{transform_indices = @transform_0, window_bounds = array<i64: 16, 128>}, {transform_indices = @transform_1, window_bounds = array<i64: 1, 128, 128>}, {transform_indices = @transform_2, window_bounds = array<i64: 1, 128>}, {transform_indices = @transform_3, window_bounds = array<i64: 128, 128>}, {pipeline_mode = #tpu.pipeline_mode<synchronous>, transform_indices = @transform_4, window_bounds = array<i64: 1, 128>}, {transform_indices = @transform_5, window_bounds = array<i64: 16, 128>}]} {
    %c0 = arith.constant 0 : index
    %c0_0 = arith.constant 0 : index
    %0 = vector.load %arg2[%c0, %c0_0] : memref<16x128xbf16, #tpu.memory_space<vmem>>, vector<16x128xbf16>
    %c0_1 = arith.constant 0 : index
    %c0_2 = arith.constant 0 : index
    %c0_3 = arith.constant 0 : index
    %1 = vector.load %arg3[%c0_1, %c0_2, %c0_3] : memref<1x128x128xbf16, #tpu.memory_space<vmem>>, vector<1x128x128xbf16>
    %2 = vector.shape_cast %1 : vector<1x128x128xbf16> to vector<128x128xbf16>
    %cst = arith.constant dense<0.000000e+00> : vector<16x128xf32>
    %3 = tpu.matmul %0, %2, %cst {dimension_numbers = #tpu.dot_dimension_numbers<[1], [0], [0], [1], [0, 0, 1, 1], [], []>} : vector<16x128xbf16>, vector<128x128xbf16>, vector<16x128xf32> -> vector<16x128xf32>
    %c0_4 = arith.constant 0 : index
    %c0_5 = arith.constant 0 : index
    %4 = vector.load %arg4[%c0_4, %c0_5] : memref<1x128xf32, #tpu.memory_space<vmem>>, vector<1x128xf32>
    %5 = vector.broadcast %4 : vector<1x128xf32> to vector<16x128xf32>
    %6 = arith.addf %3, %5 : vector<16x128xf32>
    %cst_6 = arith.constant 0.000000e+00 : f32
    %7 = vector.broadcast %cst_6 : f32 to vector<16x128xf32>
    %8 = arith.maximumf %6, %7 : vector<16x128xf32>
    %9 = arith.truncf %8 : vector<16x128xf32> to vector<16x128xbf16>
    %c0_7 = arith.constant 0 : index
    %c0_8 = arith.constant 0 : index
    %10 = vector.load %arg5[%c0_7, %c0_8] : memref<128x128xbf16, #tpu.memory_space<vmem>>, vector<128x128xbf16>
    %cst_9 = arith.constant dense<0.000000e+00> : vector<16x128xf32>
    %11 = tpu.matmul %9, %10, %cst_9 {dimension_numbers = #tpu.dot_dimension_numbers<[1], [0], [0], [1], [0, 0, 1, 1], [], []>} : vector<16x128xbf16>, vector<128x128xbf16>, vector<16x128xf32> -> vector<16x128xf32>
    %c0_10 = arith.constant 0 : index
    %c0_11 = arith.constant 0 : index
    %12 = vector.load %arg6[%c0_10, %c0_11] : memref<1x128xf32, #tpu.memory_space<vmem>>, vector<1x128xf32>
    %13 = vector.broadcast %12 : vector<1x128xf32> to vector<16x128xf32>
    %14 = arith.addf %11, %13 : vector<16x128xf32>
    %c0_12 = arith.constant 0 : index
    %c0_13 = arith.constant 0 : index
    %15 = vector.load %arg7[%c0_12, %c0_13] : memref<16x128xf32, #tpu.memory_space<vmem>>, vector<16x128xf32>
    tpu.vector_store %arg7[%c0_12, %c0_13], %14 {strides = array<i32>} : memref<16x128xf32, #tpu.memory_space<vmem>>, vector<16x128xf32>,
    return
  }
  func.func @transform_0(%arg0: i32, %arg1: i32) -> (i32, i32) {
    %c0_i32 = arith.constant 0 : i32
    %c0_i32_0 = arith.constant 0 : i32
    return %arg0, %c0_i32 : i32, i32
  }
  func.func @transform_1(%arg0: i32, %arg1: i32) -> (i32, i32, i32) {
    %c0_i32 = arith.constant 0 : i32
    %c0_i32_0 = arith.constant 0 : i32
    %c0_i32_1 = arith.constant 0 : i32
    return %arg1, %c0_i32, %c0_i32_0 : i32, i32, i32
  }
  func.func @transform_2(%arg0: i32, %arg1: i32) -> (i32, i32) {
    %c0_i32 = arith.constant 0 : i32
    %c0_i32_0 = arith.constant 0 : i32
    return %c0_i32, %arg1 : i32, i32
  }
  func.func @transform_3(%arg0: i32, %arg1: i32) -> (i32, i32) {
    %c0_i32 = arith.constant 0 : i32
    %c0_i32_0 = arith.constant 0 : i32
    return %arg1, %c0_i32 : i32, i32
  }
  func.func @transform_4(%arg0: i32, %arg1: i32) -> (i32, i32) {
    %c0_i32 = arith.constant 0 : i32
    %c0_i32_0 = arith.constant 0 : i32
    %c0_i32_1 = arith.constant 0 : i32
    return %c0_i32, %c0_i32_0 : i32, i32
  }
  func.func @transform_5(%arg0: i32, %arg1: i32) -> (i32, i32) {
    %c0_i32 = arith.constant 0 : i32
    %c0_i32_0 = arith.constant 0 : i32
    return %arg0, %c0_i32 : i32, i32
  }
}

</mosaic_0001>

<bundles_post_ra>
// kernel: tpu_custom_call.1
= control target key start
LH: loop header
LB: loop body
LE: loop exit
PB: predicated region body
PF: predicated region fallthrough
CT: control target
= control target key end

     0   :  { %10 = vsyncpa [#allocation3], 0  ;;  %s566_s0 = inlined_call_operand.hbm [shape: bf16[16,128], index: 0, kind: input, shape index: {}]   ;;  %s567_s1 = inlined_call_operand.hbm [shape: bf16[1,128,128], index: 1, kind: input, shape index: {}]   ;;  %s568_s2 = inlined_call_operand.vmem [shape: f32[1,128], index: 2, kind: input, shape index: {}]   ;;  %s569_s3 = inlined_call_operand.hbm [shape: bf16[128,128], index: 3, kind: input, shape index: {}]   ;;  %s570_s4 = inlined_call_operand.vmem [shape: f32[1,128], index: 4, kind: input, shape index: {}]   ;;  %s571_s5 = inlined_call_operand.hbm [shape: f32[16,128], index: 5, kind: output, shape index: {}]  }
   0x1   :  { %11 = vsyncpa [#allocation6], 0 }
   0x2   :  { %12 = vsyncpa [#allocation4], 0  ;;  %s508_s18 = smov [#allocation5]   ;;  %s509_s20 = smov [#allocation2]  }
   0x3   :  { %s30_s19 = sshll.u32 %s508_s18, 4  ;;  %s18_s21 = sshll.u32 %s509_s20, 4  ;;  %s31_s19 = int_to_ptr.vmem [resolvable:$true] %s30_s19  ;;  %s19_s21 = int_to_ptr.vmem [resolvable:$true] %s18_s21 }
   0x4   :  { %s430_s22 = scalar_lea.vmem %s31_s19, 1024  ;;  %p435_p1 = scmp.lt.s32.totalorder %s31_s19, %s31_s19 }
   0x5   :  { %p431_p0 = scmp.ne.s32.totalorder %s31_s19, %s430_s22  ;;  %p436_p2 = scmp.lt.s32.totalorder %s430_s22, %s430_s22 }
   0x7   :  { %p437_p3 = por %p436_p2, %p435_p1 }
   0x9   :  { %p438_p4 = pnand %p437_p3, %p431_p0 }
   0xb   :  { %441 = shalt.err (!%p438_p4)
}
   0xc   :  { %s510_s23 = smov 64   ;;  %s511_s24 = smov 4  }
   0xd   :  { %36 = dma.hbm_to_vmem [thread:$0]  %s567_s1, 1024, %s31_s19, [#allocation6], %s510_s23, %s510_s23, %s511_s24  }
   0xe   :  { %s450_s27 = scalar_lea.vmem %s19_s21, 128  ;;  %p455_p6 = scmp.lt.s32.totalorder %s19_s21, %s19_s21 }
   0xf   :  { %p451_p5 = scmp.ne.s32.totalorder %s19_s21, %s450_s27  ;;  %p456_p7 = scmp.lt.s32.totalorder %s450_s27, %s450_s27 }
  0x11   :  { %p457_p8 = por %p456_p7, %p455_p6 }
  0x13   :  { %p458_p9 = pnand %p457_p8, %p451_p5 }
  0x15   :  { %461 = shalt.err (!%p458_p9)
}
  0x16   :  { %24 = dma.hbm_to_vmem [thread:$0]  %s566_s0, 128, %s19_s21, [#allocation3], %s510_s23, %s510_s23, %s511_s24  }
  0x17   :  { %s512_s30 = smov [#allocation7]  }
  0x18   :  { %s44_s6 = sshll.u32 %s512_s30, 4  ;;  %s45_s6 = int_to_ptr.vmem [resolvable:$true] %s44_s6 }
  0x19   :  { %s470_s7 = scalar_lea.vmem %s45_s6, 1024  ;;  %p475_p11 = scmp.lt.s32.totalorder %s45_s6, %s45_s6 }
  0x1a   :  { %p471_p10 = scmp.ne.s32.totalorder %s45_s6, %s470_s7  ;;  %p476_p12 = scmp.lt.s32.totalorder %s470_s7, %s470_s7 }
  0x1c   :  { %p477_p13 = por %p476_p12, %p475_p11 }
  0x1e   :  { %p478_p0 = pnand %p477_p13, %p471_p10 }
  0x20   :  { %481 = shalt.err (!%p478_p0)
}
  0x21   :  { %50 = dma.hbm_to_vmem [thread:$0]  %s569_s3, 1024, %s45_s6, [#allocation6], %s510_s23, %s510_s23, %s511_s24  }
  0x22   :  { %502 = dma.done.wait [#allocation3], 128  }
  0x23   :  { %503 = vsyncadd [#allocation3], 4294967168 }
  0x24   :  { %504 = dma.done.wait [#allocation6], 2048  }
  0x25   :  { %505 = vsyncadd [#allocation6], 4294965248  ;;  %v513_v0 = vmov 0.0   ;;  %vm514_vm0 = vmmov 0   ;;  %v405_v1 = vld [vmem:[#allocation5 + $0x38] sm:$0xff]   ;;  %v406_v2 = vld [vmem:[#allocation5 + $0x30] sm:$0xff]  }
  0x26   :  { %355 = vmatprep.subr.bf16.mxu0 %v513_v0  ;;  %371 = vmatprep.mubr.msk.bf16.mxu0 %vm514_vm0, %v513_v0  ;;  %v407_v3 = vld [vmem:[#allocation5 + $0x28] sm:$0xff]   ;;  %v414_v4 = vld [vmem:[#allocation7 + $0x38] sm:$0xff]   ;;  %v408_v5 = vld [vmem:[#allocation5 + $0x20] sm:$0xff]   ;;  %s515_s11 = smov [#allocation8]  }
  0x27   :  { %375 = vmatprep.subr.bf16.mxu1 %v513_v0  ;;  %391 = vmatprep.mubr.msk.bf16.mxu1 %vm514_vm0, %v513_v0  ;;  %v415_v6 = vld [vmem:[#allocation7 + $0x30] sm:$0xff]   ;;  %v409_v7 = vld [vmem:[#allocation5 + $0x18] sm:$0xff]   ;;  %v416_v8 = vld [vmem:[#allocation7 + $0x28] sm:$0xff]   ;;  %s305_s12 = sshll.u32 %s515_s11, 4  ;;  %s306_s12 = int_to_ptr.vmem [resolvable:$true] %s305_s12 }
  0x28   :  { %356 = vmatpush3.bf16.msra.mxu0 %v405_v1  ;;  %376 = vmatpush3.bf16.msra.mxu1 %v414_v4  ;;  %v410_v9 = vld [vmem:[#allocation5 + $0x10] sm:$0xff]   ;;  %v417_v10 = vld [vmem:[#allocation7 + $0x20] sm:$0xff]   ;;  %v411_v11 = vld [vmem:[#allocation5 + $0x8] sm:$0xff]   ;;  %p487_p2 = scmp.lt.s32.totalorder %s306_s12, %s306_s12 }
  0x29   :  { %357 = vmatprep.subr.bf16.mxu0 %v513_v0  ;;  %377 = vmatprep.subr.bf16.mxu1 %v513_v0  ;;  %v418_v12 = vld [vmem:[#allocation7 + $0x18] sm:$0xff]   ;;  %v412_v13 = vld [vmem:[#allocation5] sm:$0xff]   ;;  %v419_v15 = vld [vmem:[#allocation7 + $0x10] sm:$0xff]  }
  0x2a   :  { %v413_v14 = vld [vmem:[#allocation2] sm:$0xff]   ;;  %v420_v16 = vld [vmem:[#allocation7 + $0x8] sm:$0xff]   ;;  %v421_v17 = vld [vmem:[#allocation7] sm:$0xff]  }
  0x2b   :  { %v318_v18 = vld [vmem:[%s568_s2] ss:$0 sm:$0xff]  ;;  %s482_s2 = scalar_lea.vmem %s306_s12, 256 }
  0x2c   :  { %358 = vmatpush3.bf16.msra.mxu0 %v406_v2  ;;  %378 = vmatpush3.bf16.msra.mxu1 %v415_v6  ;;  %v328_v28 = vld [vmem:[%s570_s4] ss:$0 sm:$0xff]  ;;  %p483_p1 = scmp.ne.s32.totalorder %s306_s12, %s482_s2  ;;  %p488_p3 = scmp.lt.s32.totalorder %s482_s2, %s482_s2 }
  0x2d   :  { %359 = vmatprep.subr.bf16.mxu0 %v513_v0  ;;  %379 = vmatprep.subr.bf16.mxu1 %v513_v0 }
  0x2e   :  { %p489_p4 = por %p488_p3, %p487_p2 }
  0x30   :  { %360 = vmatpush3.bf16.msra.mxu0 %v407_v3  ;;  %380 = vmatpush3.bf16.msra.mxu1 %v416_v8  ;;  %p490_p5 = pnand %p489_p4, %p483_p1 }
  0x31   :  { %361 = vmatprep.subr.bf16.mxu0 %v513_v0  ;;  %381 = vmatprep.subr.bf16.mxu1 %v513_v0 }
  0x34   :  { %362 = vmatpush3.bf16.msra.mxu0 %v408_v5  ;;  %382 = vmatpush3.bf16.msra.mxu1 %v417_v10 }
  0x35   :  { %363 = vmatprep.subr.bf16.mxu0 %v513_v0  ;;  %383 = vmatprep.subr.bf16.mxu1 %v513_v0 }
  0x38   :  { %364 = vmatpush3.bf16.msra.mxu0 %v409_v7  ;;  %384 = vmatpush3.bf16.msra.mxu1 %v418_v12 }
  0x39   :  { %365 = vmatprep.subr.bf16.mxu0 %v513_v0  ;;  %385 = vmatprep.subr.bf16.mxu1 %v513_v0 }
  0x3c   :  { %366 = vmatpush3.bf16.msra.mxu0 %v410_v9  ;;  %386 = vmatpush3.bf16.msra.mxu1 %v419_v15 }
  0x3d   :  { %367 = vmatprep.subr.bf16.mxu0 %v513_v0  ;;  %387 = vmatprep.subr.bf16.mxu1 %v513_v0 }
  0x40   :  { %368 = vmatpush3.bf16.msra.mxu0 %v411_v11  ;;  %388 = vmatpush3.bf16.msra.mxu1 %v420_v16 }
  0x41   :  { %369 = vmatprep.subr.bf16.mxu0 %v513_v0  ;;  %389 = vmatprep.subr.bf16.mxu1 %v513_v0 }
  0x44   :  { %370 = vmatpush3.bf16.msra.mxu0 %v412_v13  ;;  %390 = vmatpush3.bf16.msra.mxu1 %v421_v17 }
  0x47   :  { %372 = vmatmul.mubr.bf16.vlgmr.msra.gmra.mxu0 %v413_v14 }
 0x107   :  { %v176_v19 = vpop.f32.mrf.mxu0 }
 0x108   :  { %v177_v21 = vadd.f32 %v318_v18, %v176_v19 }
 0x109   :  { %v373_v20 = vpop.f32.mrf.mxu0 }
 0x10a   :  { %v183_v25 = vmax.f32 %v177_v21, 0.0 }
 0x10b   :  { %v179_v22 = vpop.f32.mrf.mxu0 }
 0x10c   :  { %v180_v23 = vadd.f32 %v318_v18, %v179_v22 }
 0x10d   :  { %v374_v24 = vpop.f32.mrf.mxu0 }
 0x10e   :  { %v184_v26 = vmax.f32 %v180_v23, 0.0 }
 0x110   :  { %v185_v27 = vpack.c.bf16 %v184_v26, %v183_v25 }
 0x112   :  { %392 = vmatmul.mubr.bf16.vlgmr.msra.gmra.mxu1 %v185_v27 }
 0x1d2   :  { %v291_v29 = vpop.f32.mrf.mxu1 }
 0x1d3   :  { %v292_v30 = vadd.f32 %v328_v28, %v291_v29 }
 0x1d4   :  { %v393_v31 = vpop.f32.mrf.mxu1 }
 0x1d5   :  { %298 = vst [vmem:[#allocation8] sm:$0xff] %v292_v30 }
 0x1d6   :  { %v294_v32 = vpop.f32.mrf.mxu1 }
 0x1d7   :  { %v295_v33 = vadd.f32 %v328_v28, %v294_v32 }
 0x1d8   :  { %v394_v34 = vpop.f32.mrf.mxu1 }
 0x1d9   :  { %299 = vst [vmem:[#allocation8 + $0x8] sm:$0xff] %v295_v33 }
 0x1da   :  { %493 = shalt.err (!%p490_p5)
}
 0x1db   :  { %s516_s13 = smov 128   ;;  %s517_s4 = smov 8  }
 0x1dc   :  { %311 = dma.vmem_to_hbm [thread:$0]  %s306_s12, 256, %s571_s5, [#allocation4], %s516_s13, %s516_s13, %s517_s4  }
 0x1dd   :  { %506 = dma.done.wait [#allocation4], 256  }
 0x1de   :  { %507 = vsyncadd [#allocation4], 4294967040 }
 0x1df   :  { %315 = vsyncpa [#allocation3], 1 }
 0x1e0   :  { %316 = vsyncpa [#allocation6], 1 }
 0x1e1   :  { %317 = vsyncpa [#allocation4], 1 }

</bundles_post_ra>
